<compile_context>
chip_gen: v5e
topology: v5e:2x2
jax: 0.10.0
libtpu: 0.0.40
codegen_flags: <defaults>
</compile_context>

<pallas_src>
import numpy as np
import jax
import jax.numpy as jnp
from jax.experimental import pallas as pl
from jax.experimental.pallas import tpu as pltpu

_IN, _H, _OUT = 4, 8, 4
_FOLD = 128 // _IN                 # 32 batch elements folded onto the lane axis
_C_IN = _IN * _FOLD                # 128  folded input width
_C_H = _H * _FOLD                  # 256  folded hidden width
_C_OUT = _OUT * _FOLD              # 128  folded output width
_W_ROWS = _C_H                     # 256  weight rows in the packed slab
_SLAB_ROWS = _W_ROWS + 8           # biases live in row _W_ROWS (sublane-aligned pad)
_SLAB_COLS = _C_H + _C_H + _C_OUT  # 640: [M1 | M2 | M3] column blocks

# [8192, 128] f32 = 4 MiB per buffer; in+out double-buffered = 16 MiB (+ slab).
# Fits every generation's VMEM (incl. v7x 64 MiB / 32 MiB scoped) with headroom,
# while one grid step still streams ~8 MiB of HBM >> 0.35 us step overhead.
_MAX_TILE_ROWS = 8192


def _round_up(n, m):
    return ((n + m - 1) // m) * m


def _cdiv(a, b):
    return -(-a // b)


def _tiling(batch):
    """Static tiling from the (trace-time) batch: (padded_batch, tile_rows, steps)."""
    rows = max(_cdiv(batch, _FOLD), 1)         # rows of the folded [*, 128] view
    if rows <= 8:
        steps = 1                              # cannot split below one sublane group
    else:
        steps = max(2, _cdiv(rows, _MAX_TILE_ROWS))
        steps += steps % 2                     # even step count -> both v7x TCs busy
    tile_rows = _round_up(_cdiv(rows, steps), 8)
    rows_p = steps * tile_rows                 # remainder-aware padding target
    return rows_p * _FOLD, tile_rows, steps


def _mlp_kernel(x_ref, p_ref, o_ref):
    """Fused Linear->ReLU->Linear->ReLU->Linear on a lane-dense folded tile.

    x_ref: [tile_rows, 128]  (32 batch elements per row, 4 features each)
    p_ref: [264, 640] resident slab: cols [0:256)=M1 (rows 0:128), [256:512)=M2,
           [512:640)=M3; row 256 holds the tiled biases.
    o_ref: [tile_rows, 128]
    """
    x = x_ref[...]

    w1 = p_ref[0:_C_IN, 0:_C_H]                            # [128, 256]
    b1 = p_ref[_W_ROWS:_W_ROWS + 1, 0:_C_H]                # [1, 256]
    h = jnp.dot(x, w1, preferred_element_type=jnp.float32) + b1
    h = jnp.maximum(h, 0.0)

    w2 = p_ref[0:_C_H, _C_H:2 * _C_H]                      # [256, 256]
    b2 = p_ref[_W_ROWS:_W_ROWS + 1, _C_H:2 * _C_H]         # [1, 256]
    h = jnp.dot(h, w2, preferred_element_type=jnp.float32) + b2
    h = jnp.maximum(h, 0.0)

    w3 = p_ref[0:_C_H, 2 * _C_H:_SLAB_COLS]                # [256, 128]
    b3 = p_ref[_W_ROWS:_W_ROWS + 1, 2 * _C_H:_SLAB_COLS]   # [1, 128]
    y = jnp.dot(h, w3, preferred_element_type=jnp.float32) + b3
    o_ref[...] = y.astype(o_ref.dtype)


@jax.jit
def x_transform_forward(x, packed_params):
    """Forward pass of x_transform.  x: [batch, 4] -> device array [batch, 4]."""
    batch = x.shape[0]
    x = x.astype(jnp.float32)
    bp, tile_rows, steps = _tiling(batch)

    if bp != batch:                            # only when batch isn't already aligned
        x = jnp.pad(x, ((0, bp - batch), (0, 0)))
    rows_p = bp // _FOLD
    x2d = x.reshape(rows_p, _C_IN)             # contiguous row-major reshape: no copy

    out2d = pl.pallas_call(
        _mlp_kernel,
        out_shape=jax.ShapeDtypeStruct((rows_p, _C_OUT), jnp.float32),
        grid=(steps,),
        in_specs=[
            pl.BlockSpec((tile_rows, _C_IN), lambda i: (i, 0)),       # batch tile
            pl.BlockSpec((_SLAB_ROWS, _SLAB_COLS), lambda i: (0, 0)),  # resident slab
        ],
        out_specs=pl.BlockSpec((tile_rows, _C_OUT), lambda i: (i, 0)),
        compiler_params=pltpu.CompilerParams(
            dimension_semantics=("parallel",),     # megacore split of the batch grid
            vmem_limit_bytes=48 * 1024 * 1024,     # ample for ~17 MiB use, v7x-safe
        ),
    )(x2d, packed_params)

    out = out2d.reshape(bp, _OUT)              # contiguous reshape: no copy
    if bp != batch:
        out = out[:batch]
    return out


def x_transform_forward_numpy(x, packed_params):
    """Mirrors the PyTorch module's .detach().numpy() return (one host copy)."""
    return np.asarray(jax.block_until_ready(x_transform_forward(x, packed_params)))


def init_params(key):
    """Deterministic init matching nn.Linear (uniform +-1/sqrt(fan_in)).

    Weights in PyTorch [out, in] layout; biases as [out].
    """
    ks = jax.random.split(key, 6)

    def lin(kw, kb, fan_in, fan_out):
        bound = 1.0 / np.sqrt(fan_in)
        w = jax.random.uniform(kw, (fan_out, fan_in), jnp.float32, -bound, bound)
        b = jax.random.uniform(kb, (fan_out,), jnp.float32, -bound, bound)
        return w, b

    w1, b1 = lin(ks[0], ks[1], _IN, _H)
    w2, b2 = lin(ks[2], ks[3], _H, _H)
    w3, b3 = lin(ks[4], ks[5], _H, _OUT)
    return dict(w1=w1, b1=b1, w2=w2, b2=b2, w3=w3, b3=b3)


def pack_params(p):
    """One-time pack of the small PyTorch-layout params into the kernel slab.

    The 32-way lane fold turns each Linear into a block-diagonal matmul:
    M_k = kron(I32, W_k^T), biases tiled 32x along the folded axis.
    """
    eye = jnp.eye(_FOLD, dtype=jnp.float32)
    m1 = jnp.kron(eye, p["w1"].T.astype(jnp.float32))   # [128, 256]
    m2 = jnp.kron(eye, p["w2"].T.astype(jnp.float32))   # [256, 256]
    m3 = jnp.kron(eye, p["w3"].T.astype(jnp.float32))   # [256, 128]
    b1 = jnp.tile(p["b1"].astype(jnp.float32), _FOLD)   # [256]
    b2 = jnp.tile(p["b2"].astype(jnp.float32), _FOLD)   # [256]
    b3 = jnp.tile(p["b3"].astype(jnp.float32), _FOLD)   # [128]

    slab = jnp.zeros((_SLAB_ROWS, _SLAB_COLS), jnp.float32)
    slab = slab.at[0:_C_IN, 0:_C_H].set(m1)
    slab = slab.at[0:_C_H, _C_H:2 * _C_H].set(m2)
    slab = slab.at[0:_C_H, 2 * _C_H:_SLAB_COLS].set(m3)
    slab = slab.at[_W_ROWS, 0:_C_H].set(b1)
    slab = slab.at[_W_ROWS, _C_H:2 * _C_H].set(b2)
    slab = slab.at[_W_ROWS, 2 * _C_H:_SLAB_COLS].set(b3)
    return slab


def _reference(x, p):
    h1 = jnp.maximum(x @ p["w1"].T + p["b1"], 0.0)
    h2 = jnp.maximum(h1 @ p["w2"].T + p["b2"], 0.0)
    return h2 @ p["w3"].T + p["b3"]


if __name__ == "__main__":
    key = jax.random.PRNGKey(0)
    kx1, kx2, kx3, kp = jax.random.split(key, 4)
    params = init_params(kp)
    packed = jax.block_until_ready(pack_params(params))

    # Tiny production-like batch (8 -> padded to 256, grid of 1).
    x_small = jax.random.normal(kx1, (8, _IN), jnp.float32)
    out_small = jax.block_until_ready(x_transform_forward(x_small, packed))
    ref_small = np.asarray(jax.block_until_ready(_reference(x_small, params)))
    assert out_small.shape == (8, _OUT)
    np.testing.assert_allclose(np.asarray(out_small), ref_small, rtol=1e-5, atol=1e-5)

    # Aligned batch: no pad/slice at all, 2-step parallel grid (one per v7x TC).
    x_mid = jax.random.normal(kx2, (512, _IN), jnp.float32)
    out_mid = jax.block_until_ready(x_transform_forward(x_mid, packed))
    ref_mid = np.asarray(jax.block_until_ready(_reference(x_mid, params)))
    assert out_mid.shape == (512, _OUT)
    np.testing.assert_allclose(np.asarray(out_mid), ref_mid, rtol=1e-5, atol=1e-5)

    # Non-multiple batch: remainder-aware padding (300 -> 512) + 2-step grid,
    # exercised through the numpy wrapper (like the module's .detach().numpy()).
    x_odd = jax.random.normal(kx3, (300, _IN), jnp.float32)
    out_odd = x_transform_forward_numpy(x_odd, packed)
    ref_odd = np.asarray(jax.block_until_ready(_reference(x_odd, params)))
    assert out_odd.shape == (300, _OUT)
    np.testing.assert_allclose(out_odd, ref_odd, rtol=1e-5, atol=1e-5)

    print("KERNEL_OK")
</pallas_src>

<mosaic_0001>
module attributes {stable_mosaic.version = 11 : i64} {
  func.func @_mlp_kernel(%arg0: i32, %arg1: memref<8x128xf32, #tpu.memory_space<vmem>>, %arg2: memref<264x640xf32, #tpu.memory_space<vmem>>, %arg3: memref<8x128xf32, #tpu.memory_space<vmem>>) attributes {dimension_semantics = [#tpu.dimension_semantics<parallel>], iteration_bounds = array<i64: 1>, scalar_prefetch = 0 : i64, scratch_operands = 0 : i64, tpu.core_type = #tpu.core_type<tc>, window_params = [{transform_indices = @transform_0, window_bounds = array<i64: 8, 128>}, {pipeline_mode = #tpu.pipeline_mode<synchronous>, transform_indices = @transform_1, window_bounds = array<i64: 264, 640>}, {transform_indices = @transform_2, window_bounds = array<i64: 8, 128>}]} {
    %c0 = arith.constant 0 : index
    %c0_0 = arith.constant 0 : index
    %0 = vector.load %arg1[%c0, %c0_0] : memref<8x128xf32, #tpu.memory_space<vmem>>, vector<8x128xf32>
    %c0_1 = arith.constant 0 : index
    %c0_2 = arith.constant 0 : index
    %1 = vector.load %arg2[%c0_1, %c0_2] : memref<264x640xf32, #tpu.memory_space<vmem>>, vector<128x256xf32>
    %c256 = arith.constant 256 : index
    %c0_3 = arith.constant 0 : index
    %2 = vector.load %arg2[%c256, %c0_3] : memref<264x640xf32, #tpu.memory_space<vmem>>, vector<1x256xf32>
    %cst = arith.constant dense<0.000000e+00> : vector<8x256xf32>
    %3 = tpu.matmul %0, %1, %cst {dimension_numbers = #tpu.dot_dimension_numbers<[1], [0], [0], [1], [0, 0, 1, 1], [], []>} : vector<8x128xf32>, vector<128x256xf32>, vector<8x256xf32> -> vector<8x256xf32>
    %4 = vector.broadcast %2 : vector<1x256xf32> to vector<8x256xf32>
    %5 = arith.addf %3, %4 : vector<8x256xf32>
    %cst_4 = arith.constant 0.000000e+00 : f32
    %6 = vector.broadcast %cst_4 : f32 to vector<8x256xf32>
    %7 = arith.maximumf %5, %6 : vector<8x256xf32>
    %c0_5 = arith.constant 0 : index
    %c256_6 = arith.constant 256 : index
    %8 = vector.load %arg2[%c0_5, %c256_6] : memref<264x640xf32, #tpu.memory_space<vmem>>, vector<256x256xf32>
    %c256_7 = arith.constant 256 : index
    %c256_8 = arith.constant 256 : index
    %9 = vector.load %arg2[%c256_7, %c256_8] : memref<264x640xf32, #tpu.memory_space<vmem>>, vector<1x256xf32>
    %cst_9 = arith.constant dense<0.000000e+00> : vector<8x256xf32>
    %10 = tpu.matmul %7, %8, %cst_9 {dimension_numbers = #tpu.dot_dimension_numbers<[1], [0], [0], [1], [0, 0, 1, 1], [], []>} : vector<8x256xf32>, vector<256x256xf32>, vector<8x256xf32> -> vector<8x256xf32>
    %11 = vector.broadcast %9 : vector<1x256xf32> to vector<8x256xf32>
    %12 = arith.addf %10, %11 : vector<8x256xf32>
    %cst_10 = arith.constant 0.000000e+00 : f32
    %13 = vector.broadcast %cst_10 : f32 to vector<8x256xf32>
    %14 = arith.maximumf %12, %13 : vector<8x256xf32>
    %c0_11 = arith.constant 0 : index
    %c512 = arith.constant 512 : index
    %15 = vector.load %arg2[%c0_11, %c512] : memref<264x640xf32, #tpu.memory_space<vmem>>, vector<256x128xf32>
    %c256_12 = arith.constant 256 : index
    %c512_13 = arith.constant 512 : index
    %16 = vector.load %arg2[%c256_12, %c512_13] : memref<264x640xf32, #tpu.memory_space<vmem>>, vector<1x128xf32>
    %cst_14 = arith.constant dense<0.000000e+00> : vector<8x128xf32>
    %17 = tpu.matmul %14, %15, %cst_14 {dimension_numbers = #tpu.dot_dimension_numbers<[1], [0], [0], [1], [0, 0, 1, 1], [], []>} : vector<8x256xf32>, vector<256x128xf32>, vector<8x128xf32> -> vector<8x128xf32>
    %18 = vector.broadcast %16 : vector<1x128xf32> to vector<8x128xf32>
    %19 = arith.addf %17, %18 : vector<8x128xf32>
    %c0_15 = arith.constant 0 : index
    %c0_16 = arith.constant 0 : index
    %20 = vector.load %arg3[%c0_15, %c0_16] : memref<8x128xf32, #tpu.memory_space<vmem>>, vector<8x128xf32>
    tpu.vector_store %arg3[%c0_15, %c0_16], %19 {strides = array<i32>} : memref<8x128xf32, #tpu.memory_space<vmem>>, vector<8x128xf32>,
    return
  }
  func.func @transform_0(%arg0: i32) -> (i32, i32) {
    %c0_i32 = arith.constant 0 : i32
    %c0_i32_0 = arith.constant 0 : i32
    return %arg0, %c0_i32 : i32, i32
  }
  func.func @transform_1(%arg0: i32) -> (i32, i32) {
    %c0_i32 = arith.constant 0 : i32
    %c0_i32_0 = arith.constant 0 : i32
    %c0_i32_1 = arith.constant 0 : i32
    return %c0_i32, %c0_i32_0 : i32, i32
  }
  func.func @transform_2(%arg0: i32) -> (i32, i32) {
    %c0_i32 = arith.constant 0 : i32
    %c0_i32_0 = arith.constant 0 : i32
    return %arg0, %c0_i32 : i32, i32
  }
}

</mosaic_0001>

<bundles_post_ra>
// kernel: x_transform_forward.1
= control target key start
LH: loop header
LB: loop body
LE: loop exit
PB: predicated region body
PF: predicated region fallthrough
CT: control target
= control target key end

     0   :  { %7 = vsyncpa [#allocation3], 0  ;;  %s370_s12 = smov [#allocation2]   ;;  %s371_s14 = smov 640   ;;  %s397_s0 = inlined_call_operand.vmem [shape: f32[8,128], index: 0, kind: input, shape index: {}]   ;;  %s398_s1 = inlined_call_operand.hbm [shape: f32[264,640], index: 1, kind: input, shape index: {}]   ;;  %s399_s2 = inlined_call_operand.vmem [shape: f32[8,128], index: 2, kind: output, shape index: {}]  }
   0x1   :  { %s14_s11 = sshll.u32 %s398_s1, 4  ;;  %s16_s13 = sshll.u32 %s370_s12, 4  ;;  %s15_s11 = int_to_ptr.hbm [resolvable:$true] %s14_s11  ;;  %s17_s13 = int_to_ptr.vmem [resolvable:$true] %s16_s13 }
   0x2   :  { %s372_s15 = smov 40  }
   0x3   :  { %22 = dma.hbm_to_vmem [thread:$0]  %s15_s11, 21120, %s17_s13, [#allocation3], %s371_s14, %s371_s14, %s372_s15  }
   0x4   :  { %368 = dma.done.wait [#allocation3], 21120  }
   0x5   :  { %369 = vsyncadd [#allocation3], 4294946176  ;;  %v58_v0 = vld [vmem:[#allocation2 + $0x258] sm:$0xff]  ;;  %v56_v1 = vld [vmem:[#allocation2 + $0x230] sm:$0xff] }
   0x6   :  { %v59_v2 = vld [vmem:[#allocation2 + $0x260] sm:$0xff]  ;;  %67 = vmatpush.msra.mxu0 %v58_v0  ;;  %v57_v3 = vld [vmem:[#allocation2 + $0x238] sm:$0xff]  ;;  %v54_v4 = vld [vmem:[#allocation2 + $0x208] sm:$0xff] }
   0x7   :  { %87 = vmatpush.msra.mxu1 %v59_v2  ;;  %v55_v5 = vld [vmem:[#allocation2 + $0x210] sm:$0xff]  ;;  %v52_v6 = vld [vmem:[#allocation2 + $0x1e0] sm:$0xff]  ;;  %v53_v7 = vld [vmem:[#allocation2 + $0x1e8] sm:$0xff] }
   0x8   :  { %68 = vmatpush.msra.mxu0 %v56_v1  ;;  %v50_v8 = vld [vmem:[#allocation2 + $0x1b8] sm:$0xff]  ;;  %v51_v9 = vld [vmem:[#allocation2 + $0x1c0] sm:$0xff]  ;;  %v48_v10 = vld [vmem:[#allocation2 + $0x190] sm:$0xff] }
   0x9   :  { %88 = vmatpush.msra.mxu1 %v57_v3  ;;  %v49_v11 = vld [vmem:[#allocation2 + $0x198] sm:$0xff]  ;;  %v46_v12 = vld [vmem:[#allocation2 + $0x168] sm:$0xff]  ;;  %v47_v13 = vld [vmem:[#allocation2 + $0x170] sm:$0xff] }
   0xa   :  { %69 = vmatpush.msra.mxu0 %v54_v4  ;;  %v139_v14 = vld [vmem:[#allocation2 + $0x268] sm:$0xff]  ;;  %v137_v15 = vld [vmem:[#allocation2 + $0x240] sm:$0xff]  ;;  %v135_v19 = vld [vmem:[#allocation2 + $0x218] sm:$0xff] }
   0xb   :  { %89 = vmatpush.msra.mxu1 %v55_v5  ;;  %v44_v16 = vld [vmem:[#allocation2 + $0x140] sm:$0xff]  ;;  %v45_v17 = vld [vmem:[#allocation2 + $0x148] sm:$0xff]  ;;  %180 = vmatpush.msra.mxu2 %v139_v14  ;;  %v42_v21 = vld [vmem:[#allocation2 + $0x118] sm:$0xff] }
   0xc   :  { %70 = vmatpush.msra.mxu0 %v52_v6  ;;  %v171_v18 = vld [vmem:[#allocation2 + $0x4e8] sm:$0xff]  ;;  %v169_v20 = vld [vmem:[#allocation2 + $0x4c0] sm:$0xff]  ;;  %v133_v23 = vld [vmem:[#allocation2 + $0x1f0] sm:$0xff] }
   0xd   :  { %90 = vmatpush.msra.mxu1 %v53_v7  ;;  %v43_v22 = vld [vmem:[#allocation2 + $0x120] sm:$0xff]  ;;  %181 = vmatpush.msra.mxu2 %v137_v15  ;;  %v167_v24 = vld [vmem:[#allocation2 + $0x498] sm:$0xff]  ;;  %v40_v25 = vld [vmem:[#allocation2 + $0xf0] sm:$0xff] }
   0xe   :  { %71 = vmatpush.msra.mxu0 %v50_v8  ;;  %200 = vmatpush.msra.mxu3 %v171_v18  ;;  %v41_v26 = vld [vmem:[#allocation2 + $0xf8] sm:$0xff]  ;;  %v131_v27 = vld [vmem:[#allocation2 + $0x1c8] sm:$0xff]  ;;  %v165_v28 = vld [vmem:[#allocation2 + $0x470] sm:$0xff] }
   0xf   :  { %91 = vmatpush.msra.mxu1 %v51_v9  ;;  %182 = vmatpush.msra.mxu2 %v135_v19  ;;  %v38_v29 = vld [vmem:[#allocation2 + $0xc8] sm:$0xff]  ;;  %v39_v30 = vld [vmem:[#allocation2 + $0xd0] sm:$0xff]  ;;  %v129_v31 = vld [vmem:[#allocation2 + $0x1a0] sm:$0xff] }
  0x10   :  { %72 = vmatpush.msra.mxu0 %v48_v10  ;;  %201 = vmatpush.msra.mxu3 %v169_v20  ;;  %v163_v32 = vld [vmem:[#allocation2 + $0x448] sm:$0xff]  ;;  %v36_v33 = vld [vmem:[#allocation2 + $0xa0] sm:$0xff]  ;;  %v127_v35 = vld [vmem:[#allocation2 + $0x178] sm:$0xff] }
  0x11   :  { %92 = vmatpush.msra.mxu1 %v49_v11  ;;  %183 = vmatpush.msra.mxu2 %v133_v23  ;;  %v37_v34 = vld [vmem:[#allocation2 + $0xa8] sm:$0xff]  ;;  %v161_v36 = vld [vmem:[#allocation2 + $0x420] sm:$0xff]  ;;  %v34_v37 = vld [vmem:[#allocation2 + $0x78] sm:$0xff] }
  0x12   :  { %73 = vmatpush.msra.mxu0 %v46_v12  ;;  %202 = vmatpush.msra.mxu3 %v167_v24  ;;  %v35_v38 = vld [vmem:[#allocation2 + $0x80] sm:$0xff]  ;;  %v125_v39 = vld [vmem:[#allocation2 + $0x150] sm:$0xff]  ;;  %v159_v40 = vld [vmem:[#allocation2 + $0x3f8] sm:$0xff] }
  0x13   :  { %93 = vmatpush.msra.mxu1 %v47_v13  ;;  %184 = vmatpush.msra.mxu2 %v131_v27  ;;  %v32_v41 = vld [vmem:[#allocation2 + $0x50] sm:$0xff]  ;;  %v33_v42 = vld [vmem:[#allocation2 + $0x58] sm:$0xff]  ;;  %v123_v43 = vld [vmem:[#allocation2 + $0x128] sm:$0xff] }
  0x14   :  { %74 = vmatpush.msra.mxu0 %v44_v16  ;;  %203 = vmatpush.msra.mxu3 %v165_v28  ;;  %v157_v44 = vld [vmem:[#allocation2 + $0x3d0] sm:$0xff]  ;;  %v30_v45 = vld [vmem:[#allocation2 + $0x28] sm:$0xff]  ;;  %v121_v47 = vld [vmem:[#allocation2 + $0x100] sm:$0xff] }
  0x15   :  { %94 = vmatpush.msra.mxu1 %v45_v17  ;;  %185 = vmatpush.msra.mxu2 %v129_v31  ;;  %v31_v46 = vld [vmem:[#allocation2 + $0x30] sm:$0xff]  ;;  %v155_v48 = vld [vmem:[#allocation2 + $0x3a8] sm:$0xff]  ;;  %v28_v49 = vld [vmem:[#allocation2] sm:$0xff] }
  0x16   :  { %75 = vmatpush.msra.mxu0 %v42_v21  ;;  %204 = vmatpush.msra.mxu3 %v163_v32  ;;  %v29_v50 = vld [vmem:[#allocation2 + $0x8] sm:$0xff]  ;;  %v27_v51 = vld [vmem:[%s397_s0] sm:$0xff]  ;;  %v140_v52 = vld [vmem:[#allocation2 + $0x270] sm:$0xff] }
  0x17   :  { %95 = vmatpush.msra.mxu1 %v43_v22  ;;  %186 = vmatpush.msra.mxu2 %v127_v35  ;;  %v172_v53 = vld [vmem:[#allocation2 + $0x4f0] sm:$0xff]  ;;  %v119_v54 = vld [vmem:[#allocation2 + $0xd8] sm:$0xff]  ;;  %v153_v55 = vld [vmem:[#allocation2 + $0x380] sm:$0xff] }
  0x18   :  { %76 = vmatpush.msra.mxu0 %v40_v25  ;;  %205 = vmatpush.msra.mxu3 %v161_v36  ;;  %v138_v56 = vld [vmem:[#allocation2 + $0x248] sm:$0xff]  ;;  %v117_v58 = vld [vmem:[#allocation2 + $0xb0] sm:$0xff]  ;;  %v151_v59 = vld [vmem:[#allocation2 + $0x358] sm:$0xff] }
  0x19   :  { %96 = vmatpush.msra.mxu1 %v41_v26  ;;  %187 = vmatpush.msra.mxu2 %v125_v39  ;;  %v170_v57 = vld [vmem:[#allocation2 + $0x4c8] sm:$0xff]  ;;  %v136_v60 = vld [vmem:[#allocation2 + $0x220] sm:$0xff]  ;;  %v149_v63 = vld [vmem:[#allocation2 + $0x330] sm:$0xff] }
  0x1a   :  { %77 = vmatpush.msra.mxu0 %v38_v29  ;;  %206 = vmatpush.msra.mxu3 %v159_v40  ;;  %v168_v61 = vld [vmem:[#allocation2 + $0x4a0] sm:$0xff]  ;;  %v115_v62 = vld [vmem:[#allocation2 + $0x88] sm:$0xff]  ;;  %v134_v0 = vld [vmem:[#allocation2 + $0x1f8] sm:$0xff] }
  0x1b   :  { %97 = vmatpush.msra.mxu1 %v39_v30  ;;  %188 = vmatpush.msra.mxu2 %v123_v43  ;;  %v166_v1 = vld [vmem:[#allocation2 + $0x478] sm:$0xff]  ;;  %v132_v2 = vld [vmem:[#allocation2 + $0x1d0] sm:$0xff]  ;;  %v130_v4 = vld [vmem:[#allocation2 + $0x1a8] sm:$0xff] }
  0x1c   :  { %78 = vmatpush.msra.mxu0 %v36_v33  ;;  %207 = vmatpush.msra.mxu3 %v157_v44  ;;  %v164_v3 = vld [vmem:[#allocation2 + $0x450] sm:$0xff]  ;;  %v162_v5 = vld [vmem:[#allocation2 + $0x428] sm:$0xff]  ;;  %v128_v6 = vld [vmem:[#allocation2 + $0x180] sm:$0xff] }
  0x1d   :  { %98 = vmatpush.msra.mxu1 %v37_v34  ;;  %189 = vmatpush.msra.mxu2 %v121_v47  ;;  %v160_v7 = vld [vmem:[#allocation2 + $0x400] sm:$0xff]  ;;  %v126_v8 = vld [vmem:[#allocation2 + $0x158] sm:$0xff]  ;;  %v124_v10 = vld [vmem:[#allocation2 + $0x130] sm:$0xff] }
  0x1e   :  { %79 = vmatpush.msra.mxu0 %v34_v37  ;;  %208 = vmatpush.msra.mxu3 %v155_v48  ;;  %v158_v9 = vld [vmem:[#allocation2 + $0x3d8] sm:$0xff]  ;;  %v156_v11 = vld [vmem:[#allocation2 + $0x3b0] sm:$0xff]  ;;  %v122_v12 = vld [vmem:[#allocation2 + $0x108] sm:$0xff] }
  0x1f   :  { %99 = vmatpush.msra.mxu1 %v35_v38  ;;  %190 = vmatpush.msra.mxu2 %v119_v54  ;;  %v154_v13 = vld [vmem:[#allocation2 + $0x388] sm:$0xff]  ;;  %v120_v14 = vld [vmem:[#allocation2 + $0xe0] sm:$0xff]  ;;  %v118_v16 = vld [vmem:[#allocation2 + $0xb8] sm:$0xff] }
  0x20   :  { %80 = vmatpush.msra.mxu0 %v32_v41  ;;  %209 = vmatpush.msra.mxu3 %v153_v55  ;;  %v152_v15 = vld [vmem:[#allocation2 + $0x360] sm:$0xff]  ;;  %v150_v17 = vld [vmem:[#allocation2 + $0x338] sm:$0xff]  ;;  %v116_v18 = vld [vmem:[#allocation2 + $0x90] sm:$0xff] }
  0x21   :  { %100 = vmatpush.msra.mxu1 %v33_v42  ;;  %191 = vmatpush.msra.mxu2 %v117_v58  ;;  %v113_v19 = vld [vmem:[#allocation2 + $0x60] sm:$0xff]  ;;  %v147_v20 = vld [vmem:[#allocation2 + $0x308] sm:$0xff]  ;;  %v148_v22 = vld [vmem:[#allocation2 + $0x310] sm:$0xff] }
  0x22   :  { %81 = vmatpush.msra.mxu0 %v30_v45  ;;  %210 = vmatpush.msra.mxu3 %v151_v59  ;;  %v114_v21 = vld [vmem:[#allocation2 + $0x68] sm:$0xff]  ;;  %v111_v23 = vld [vmem:[#allocation2 + $0x38] sm:$0xff]  ;;  %v145_v24 = vld [vmem:[#allocation2 + $0x2e0] sm:$0xff] }
  0x23   :  { %101 = vmatpush.msra.mxu1 %v31_v46  ;;  %192 = vmatpush.msra.mxu2 %v115_v62  ;;  %v112_v25 = vld [vmem:[#allocation2 + $0x40] sm:$0xff]  ;;  %v146_v26 = vld [vmem:[#allocation2 + $0x2e8] sm:$0xff]  ;;  %v109_v27 = vld [vmem:[#allocation2 + $0x10] sm:$0xff] }
  0x24   :  { %82 = vmatpush.msra.mxu0 %v28_v49  ;;  %211 = vmatpush.msra.mxu3 %v149_v63  ;;  %v143_v28 = vld [vmem:[#allocation2 + $0x2b8] sm:$0xff]  ;;  %v144_v30 = vld [vmem:[#allocation2 + $0x2c0] sm:$0xff]  ;;  %v141_v31 = vld [vmem:[#allocation2 + $0x290] sm:$0xff] }
  0x25   :  { %102 = vmatpush.msra.mxu1 %v29_v50  ;;  %83 = vmatmul.f32.vlgmr.msra.gmra.mxu0 %v27_v51  ;;  %v110_v29 = vld [vmem:[#allocation2 + $0x18] sm:$0xff]  ;;  %v292_v34 = vld [vmem:[#allocation2 + $0x4d0] sm:$0xff]  ;;  %v291_v37 = vld [vmem:[#allocation2 + $0x4a8] sm:$0xff] }
  0x26   :  { %103 = vmatmul.f32.vlgmr.msra.gmra.mxu1 %v27_v51  ;;  %220 = vmatpush.msrb.mxu0 %v140_v52  ;;  %v142_v32 = vld [vmem:[#allocation2 + $0x298] sm:$0xff]  ;;  %v276_v36 = vld [vmem:[#allocation2 + $0x250] sm:$0xff]  ;;  %v275_v38 = vld [vmem:[#allocation2 + $0x228] sm:$0xff] }
  0x27   :  { %240 = vmatpush.msrb.mxu1 %v172_v53  ;;  %193 = vmatpush.msra.mxu2 %v113_v19  ;;  %v293_v33 = vld [vmem:[#allocation2 + $0x4f8] sm:$0xff]  ;;  %v290_v39 = vld [vmem:[#allocation2 + $0x480] sm:$0xff]  ;;  %v288_v43 = vld [vmem:[#allocation2 + $0x430] sm:$0xff] }
  0x28   :  { %221 = vmatpush.msrb.mxu0 %v138_v56  ;;  %212 = vmatpush.msra.mxu3 %v147_v20  ;;  %v277_v35 = vld [vmem:[#allocation2 + $0x278] sm:$0xff]  ;;  %v274_v40 = vld [vmem:[#allocation2 + $0x200] sm:$0xff]  ;;  %v272_v44 = vld [vmem:[#allocation2 + $0x1b0] sm:$0xff] }
  0x29   :  { %241 = vmatpush.msrb.mxu1 %v170_v57  ;;  %194 = vmatpush.msra.mxu2 %v111_v23  ;;  %v289_v41 = vld [vmem:[#allocation2 + $0x458] sm:$0xff]  ;;  %v287_v45 = vld [vmem:[#allocation2 + $0x408] sm:$0xff]  ;;  %v286_v47 = vld [vmem:[#allocation2 + $0x3e0] sm:$0xff] }
  0x2a   :  { %222 = vmatpush.msrb.mxu0 %v136_v60  ;;  %213 = vmatpush.msra.mxu3 %v145_v24  ;;  %v273_v42 = vld [vmem:[#allocation2 + $0x1d8] sm:$0xff]  ;;  %v271_v46 = vld [vmem:[#allocation2 + $0x188] sm:$0xff]  ;;  %v270_v48 = vld [vmem:[#allocation2 + $0x160] sm:$0xff] }
  0x2b   :  { %242 = vmatpush.msrb.mxu1 %v168_v61  ;;  %195 = vmatpush.msra.mxu2 %v109_v27  ;;  %v285_v49 = vld [vmem:[#allocation2 + $0x3b8] sm:$0xff]  ;;  %v284_v51 = vld [vmem:[#allocation2 + $0x390] sm:$0xff]  ;;  %v283_v52 = vld [vmem:[#allocation2 + $0x368] sm:$0xff] }
  0x2c   :  { %223 = vmatpush.msrb.mxu0 %v134_v0  ;;  %214 = vmatpush.msra.mxu3 %v143_v28  ;;  %v269_v50 = vld [vmem:[#allocation2 + $0x138] sm:$0xff]  ;;  %v61_v53 = vld [vmem:[#allocation2 + $0x500] ss:$8 sm:$0x3]  ;;  %v268_v63 = vld [vmem:[#allocation2 + $0x110] sm:$0xff] }
  0x2d   :  { %243 = vmatpush.msrb.mxu1 %v166_v1  ;;  %295 = vmatpush.msrb.mxu2 %v277_v35  ;;  %v282_v54 = vld [vmem:[#allocation2 + $0x340] sm:$0xff]  ;;  %v63_v55 = vperm.slane %v61_v53, 0  ;;  %v64_v56 = vperm.slane %v61_v53, 1  ;;  %v281_v0 = vld [vmem:[#allocation2 + $0x318] sm:$0xff]  ;;  %v267_v1 = vld [vmem:[#allocation2 + $0xe8] sm:$0xff] }
  0x2e   :  { %224 = vmatpush.msrb.mxu0 %v132_v2  ;;  %215 = vmatpush.msra.mxu3 %v141_v31  ;;  %v280_v2 = vld [vmem:[#allocation2 + $0x2f0] sm:$0xff]  ;;  %v294_v23 = vld [vmem:[#allocation2 + $0x520] ss:$0 sm:$0xff] }
  0x2f   :  { %244 = vmatpush.msrb.mxu1 %v164_v3  ;;  %296 = vmatpush.msrb.mxu2 %v276_v36  ;;  %v266_v3 = vld [vmem:[#allocation2 + $0xc0] sm:$0xff] }
  0x30   :  { %225 = vmatpush.msrb.mxu0 %v130_v4  ;;  %315 = vmatpush.msrb.mxu3 %v293_v33  ;;  %v279_v4 = vld [vmem:[#allocation2 + $0x2c8] sm:$0xff] }
  0x31   :  { %245 = vmatpush.msrb.mxu1 %v162_v5  ;;  %297 = vmatpush.msrb.mxu2 %v275_v38  ;;  %v265_v5 = vld [vmem:[#allocation2 + $0x98] sm:$0xff] }
  0x32   :  { %226 = vmatpush.msrb.mxu0 %v128_v6  ;;  %316 = vmatpush.msrb.mxu3 %v292_v34  ;;  %v278_v6 = vld [vmem:[#allocation2 + $0x2a0] sm:$0xff] }
  0x33   :  { %246 = vmatpush.msrb.mxu1 %v160_v7  ;;  %298 = vmatpush.msrb.mxu2 %v274_v40  ;;  %v264_v7 = vld [vmem:[#allocation2 + $0x70] sm:$0xff] }
  0x34   :  { %227 = vmatpush.msrb.mxu0 %v126_v8  ;;  %317 = vmatpush.msrb.mxu3 %v291_v37  ;;  %v263_v8 = vld [vmem:[#allocation2 + $0x48] sm:$0xff] }
  0x35   :  { %247 = vmatpush.msrb.mxu1 %v158_v9  ;;  %299 = vmatpush.msrb.mxu2 %v273_v42  ;;  %v262_v9 = vld [vmem:[#allocation2 + $0x20] sm:$0xff] }
  0x36   :  { %228 = vmatpush.msrb.mxu0 %v124_v10  ;;  %318 = vmatpush.msrb.mxu3 %v290_v39  ;;  %v174_v10 = vld [vmem:[#allocation2 + $0x510] ss:$8 sm:$0x3] }
  0x37   :  { %248 = vmatpush.msrb.mxu1 %v156_v11  ;;  %300 = vmatpush.msrb.mxu2 %v272_v44  ;;  %v177_v11 = vperm.slane %v174_v10, 1 }
  0x38   :  { %229 = vmatpush.msrb.mxu0 %v122_v12  ;;  %319 = vmatpush.msrb.mxu3 %v289_v41 }
  0x39   :  { %249 = vmatpush.msrb.mxu1 %v154_v13  ;;  %301 = vmatpush.msrb.mxu2 %v271_v46 }
  0x3a   :  { %230 = vmatpush.msrb.mxu0 %v120_v14  ;;  %320 = vmatpush.msrb.mxu3 %v288_v43 }
  0x3b   :  { %250 = vmatpush.msrb.mxu1 %v152_v15  ;;  %302 = vmatpush.msrb.mxu2 %v270_v48 }
  0x3c   :  { %231 = vmatpush.msrb.mxu0 %v118_v16  ;;  %321 = vmatpush.msrb.mxu3 %v287_v45  ;;  %v176_v16 = vperm.slane %v174_v10, 0 }
  0x3d   :  { %251 = vmatpush.msrb.mxu1 %v150_v17  ;;  %303 = vmatpush.msrb.mxu2 %v269_v50 }
  0x3e   :  { %232 = vmatpush.msrb.mxu0 %v116_v18  ;;  %322 = vmatpush.msrb.mxu3 %v286_v47 }
  0x3f   :  { %252 = vmatpush.msrb.mxu1 %v148_v22  ;;  %304 = vmatpush.msrb.mxu2 %v268_v63 }
  0x40   :  { %233 = vmatpush.msrb.mxu0 %v114_v21  ;;  %323 = vmatpush.msrb.mxu3 %v285_v49 }
  0x41   :  { %253 = vmatpush.msrb.mxu1 %v146_v26  ;;  %305 = vmatpush.msrb.mxu2 %v267_v1 }
  0x42   :  { %234 = vmatpush.msrb.mxu0 %v112_v25  ;;  %324 = vmatpush.msrb.mxu3 %v284_v51 }
  0x43   :  { %254 = vmatpush.msrb.mxu1 %v144_v30  ;;  %306 = vmatpush.msrb.mxu2 %v266_v3 }
  0x44   :  { %235 = vmatpush.msrb.mxu0 %v110_v29  ;;  %325 = vmatpush.msrb.mxu3 %v283_v52 }
  0x45   :  { %255 = vmatpush.msrb.mxu1 %v142_v32  ;;  %307 = vmatpush.msrb.mxu2 %v265_v5 }
  0x46   :  { %326 = vmatpush.msrb.mxu3 %v282_v54 }
  0x47   :  { %308 = vmatpush.msrb.mxu2 %v264_v7 }
  0x48   :  { %327 = vmatpush.msrb.mxu3 %v281_v0 }
  0x49   :  { %309 = vmatpush.msrb.mxu2 %v263_v8 }
  0x4a   :  { %328 = vmatpush.msrb.mxu3 %v280_v2 }
  0x4b   :  { %310 = vmatpush.msrb.mxu2 %v262_v9 }
  0x4c   :  { %329 = vmatpush.msrb.mxu3 %v279_v4 }
  0x4e   :  { %330 = vmatpush.msrb.mxu3 %v278_v6 }
  0xa2   :  { %v84_v57 = vpop.f32.mrf.mxu0 }
  0xa3   :  { %v104_v58 = vpop.f32.mrf.mxu1  ;;  %v85_v59 = vadd.f32 %v84_v57, %v63_v55 }
  0xa4   :  { %v105_v60 = vadd.f32 %v104_v58, %v64_v56 }
  0xa5   :  { %v107_v61 = vmax.f32 %v85_v59, 0.0 }
  0xa6   :  { %v108_v62 = vmax.f32 %v105_v60, 0.0 }
  0xa7   :  { %196 = vmatmul.f32.vlgmr.msra.gmra.mxu2 %v107_v61  ;;  %236 = vmatmul.f32.vlgmr.msrb.gmra.mxu0 %v107_v61 }
  0xa8   :  { %216 = vmatmul.f32.vlgmr.msra.gmra.mxu3 %v108_v62  ;;  %256 = vmatmul.f32.vlgmr.msrb.gmra.mxu1 %v108_v62 }
 0x124   :  { %v237_v12 = vpop.f32.mrf.mxu0 }
 0x125   :  { %v238_v13 = vadd.f32 %v237_v12, %v177_v11  ;;  %v257_v14 = vpop.f32.mrf.mxu1 }
 0x127   :  { %v258_v15 = vadd.f32 %v257_v14, %v238_v13 }
 0x129   :  { %v261_v17 = vmax.f32 %v258_v15, 0.0 }
 0x12a   :  { %v197_v18 = vpop.f32.mrf.mxu2 }
 0x12b   :  { %v198_v19 = vadd.f32 %v197_v18, %v176_v16  ;;  %331 = vmatmul.f32.vlgmr.msrb.gmra.mxu3 %v261_v17  ;;  %v217_v20 = vpop.f32.mrf.mxu3 }
 0x12d   :  { %v218_v21 = vadd.f32 %v217_v20, %v198_v19 }
 0x12f   :  { %v260_v22 = vmax.f32 %v218_v21, 0.0 }
 0x131   :  { %311 = vmatmul.f32.vlgmr.msrb.gmra.mxu2 %v260_v22 }
 0x1ae   :  { %v332_v26 = vpop.f32.mrf.mxu3 }
 0x1b4   :  { %v312_v24 = vpop.f32.mrf.mxu2 }
 0x1b5   :  { %v313_v25 = vadd.f32 %v312_v24, %v294_v23 }
 0x1b7   :  { %v333_v27 = vadd.f32 %v332_v26, %v313_v25 }
 0x1b9   :  { %335 = vst [vmem:[%s399_s2] sm:$0xff] %v333_v27 }
 0x1ba   :  { %340 = vsyncpa [#allocation3], 1 }

</bundles_post_ra>
